<compile_context>
chip_gen: v7x
topology: tpu7x:2x2x1
jax: 0.10.0
libtpu: 0.0.40
codegen_flags: <defaults>
</compile_context>

<pallas_src>
import functools
import math

import numpy as np
import jax
import jax.numpy as jnp
from jax.experimental import pallas as pl
from jax.experimental.pallas import tpu as pltpu


def _round_up(a: int, m: int) -> int:
    return ((a + m - 1) // m) * m


def _make_kernel(grid_edge: int, grid_scale: float, project_to_grid: bool,
                 n_points: int):
    E = int(grid_edge)
    EE = E * E
    Ef = float(E)
    inv = Ef / float(grid_scale)          # fold "/ grid_scale * grid_edge"

    def kernel(xy_ref, out_ref):
        # xy_ref: (2, TB, Np) f32, already zero-subtracted in the wrapper.
        #   slab 0 = x coords, slab 1 = y coords (env on sublane, point on lane).
        # out_ref: (TB, EE) f32 flattened grid rows.
        x = xy_ref[0]                                   # (TB, Np)
        y = xy_ref[1]                                   # (TB, Np)
        gsx = x * inv
        gsy = y * inv
        if project_to_grid:
            # One true divide; second ratio derived: gry = E*E / gtx.
            # TODO(synk): /0 guards (inf sentinels) diverge from the PyTorch
            # reference, which would produce inf/nan or raise ZeroDivisionError.
            safe_y = jnp.where(gsy == 0.0, 1.0, gsy)
            gtx = jnp.where(gsy == 0.0, jnp.inf, gsx / safe_y * Ef)
            safe_t = jnp.where(gtx == 0.0, 1.0, gtx)
            gry = jnp.where(gsx == 0.0, jnp.inf, (Ef * Ef) / safe_t)
            c1 = gtx < Ef
            gx_f = jnp.where(c1, jnp.floor(gtx), Ef - 1.0)
            gy_f = jnp.where(c1, Ef - 1.0,
                             jnp.where(gry < Ef, jnp.floor(gry), Ef - 1.0))
        else:
            gx_f = jnp.minimum(jnp.floor(gsx), Ef - 1.0)
            gy_f = jnp.minimum(jnp.floor(gsy), Ef - 1.0)
        gx = gx_f.astype(jnp.int32)
        gy = gy_f.astype(jnp.int32)
        # torch wraps one negative period (grid[-1] lights the last cell).
        gx = jnp.where(gx < 0, gx + E, gx)
        gy = jnp.where(gy < 0, gy + E, gy)
        # TODO(synk): points more than one grid period out of range are
        # silently dropped; torch would raise IndexError.
        valid = (gx >= 0) & (gx < E) & (gy >= 0) & (gy < E)
        flat = jnp.where(valid, gx * E + gy, -1)        # (TB, Np) flat cell id

        ids = jax.lax.broadcasted_iota(jnp.int32, (1, EE), 1)   # (1, EE)
        acc = None
        for p in range(n_points):                        # Np is small; unrolled
            hit = flat[:, p:p + 1] == ids                # (TB, EE) bool
            acc = hit if acc is None else jnp.logical_or(acc, hit)
        # Single dense, lane-aligned store (EE multiple of 128 for E=16).
        out_ref[...] = acc.astype(jnp.float32)

    return kernel


@functools.partial(
    jax.jit,
    static_argnames=("grid_edge", "grid_scale", "use_lidar",
                     "project_to_grid", "env_block"))
def flat_nngrid_forward_batched(ob, hull_xy, bodies, joints, lidar_p2, *,
                                grid_edge, grid_scale, use_lidar=True,
                                project_to_grid=False, env_block=128):
    """Batched FlatNNGrid forward.

    ob       : (B, observation_dim) float32
    hull_xy  : (B, 2)   float32  -> (hull_x, hull_y) per env
    bodies   : (B, Nb, 2) float32
    joints   : (B, Nj, 4) float32 -> (A_x, A_y, B_x, B_y)
    lidar_p2 : (B, Nl, 2) float32 (ignored if use_lidar=False)
    returns  : (B, observation_dim + grid_edge**2) float32
    """
    E = int(grid_edge)
    EE = E * E
    B, _ = ob.shape

    ob = ob.astype(jnp.float32)
    hull = hull_xy.astype(jnp.float32)                   # (B, 2)

    # Pack bodies + both joint endpoints + lidar p2 into ONE point set and
    # fold in zero = hull - 0.5*grid_scale here (XLA, free under jit): one
    # kernel input, no tiny per-step hull DMA.
    parts = [bodies.astype(jnp.float32),
             joints[..., 0:2].astype(jnp.float32),
             joints[..., 2:4].astype(jnp.float32)]
    if use_lidar:
        parts.append(lidar_p2.astype(jnp.float32))
    pts = jnp.concatenate(parts, axis=1)                 # (B, Np, 2)
    Np = pts.shape[1]
    zero = hull - 0.5 * float(grid_scale)                # (B, 2)
    pts = pts - zero[:, None, :]
    xy = jnp.transpose(pts, (2, 0, 1))                   # (2, B, Np)

    # Env-block size: multiple of 8, capped by the (padded) batch.
    tb = max(8, min(_round_up(int(env_block), 8), _round_up(B, 8)))
    Bp = _round_up(B, tb)
    if Bp != B:
        xy = jnp.pad(xy, ((0, 0), (0, Bp - B), (0, 0)))
    nsteps = Bp // tb

    kernel = _make_kernel(E, float(grid_scale), project_to_grid, Np)
    grid_rows = pl.pallas_call(
        kernel,
        out_shape=jax.ShapeDtypeStruct((Bp, EE), jnp.float32),
        grid=(nsteps,),
        in_specs=[pl.BlockSpec((2, tb, Np), lambda b: (0, b, 0))],
        out_specs=pl.BlockSpec((tb, EE), lambda b: (b, 0)),
        compiler_params=pltpu.CompilerParams(
            dimension_semantics=("parallel",)),
    )(xy)

    # Module output layout: [ob | grid.view(1, -1)] (row-major == gx*E + gy).
    return jnp.concatenate([ob, grid_rows[:B]], axis=1)


def flat_nngrid_forward(ob, hull_xy, bodies, joints, lidar_p2, *,
                        grid_edge, grid_scale, use_lidar=True,
                        project_to_grid=False):
    """Single-environment wrapper matching the module: ob (1, obs_dim)."""
    lid = None if lidar_p2 is None else lidar_p2[None]
    return flat_nngrid_forward_batched(
        ob, hull_xy[None, :], bodies[None], joints[None], lid,
        grid_edge=grid_edge, grid_scale=grid_scale,
        use_lidar=use_lidar, project_to_grid=project_to_grid)


def _reference_numpy(ob, hull_xy, bodies, joints, lidar_p2, *,
                     grid_edge, grid_scale, use_lidar, project_to_grid):
    """Pure-numpy mirror of the PyTorch module (for a sanity check)."""
    E = grid_edge
    scale = np.float32(grid_scale)
    grid = np.zeros((E, E), dtype=np.float32)
    zx = np.float32(hull_xy[0]) - scale * np.float32(0.5)
    zy = np.float32(hull_xy[1]) - scale * np.float32(0.5)

    def c2g(x, y):
        gsx = (np.float32(x) - zx) / scale * np.float32(E)
        gsy = (np.float32(y) - zy) / scale * np.float32(E)
        if project_to_grid:
            gtx = gsx / gsy * np.float32(E)
            gry = gsy / gsx * np.float32(E)
            if gtx < E:
                return (math.floor(gtx), E - 1)
            elif gry < E:
                return (E - 1, math.floor(gry))
            return (E - 1, E - 1)
        return (min(math.floor(gsx), E - 1), min(math.floor(gsy), E - 1))

    for b in bodies:
        gx, gy = c2g(b[0], b[1]); grid[gx, gy] = 1.0
    for j in joints:
        gx, gy = c2g(j[0], j[1]); grid[gx, gy] = 1.0
        gx, gy = c2g(j[2], j[3]); grid[gx, gy] = 1.0
    if use_lidar:
        for l in lidar_p2:
            gx, gy = c2g(l[0], l[1]); grid[gx, gy] = 1.0
    return np.concatenate([ob, grid.reshape(1, -1)], axis=1)


def _check_batch(out, ob, hull_xy, bodies, joints, lidar_p2, *,
                 grid_edge, grid_scale, use_lidar, project_to_grid):
    ob_np = np.asarray(ob); hull_np = np.asarray(hull_xy)
    bodies_np = np.asarray(bodies); joints_np = np.asarray(joints)
    lidar_np = np.asarray(lidar_p2)
    for b in range(ob_np.shape[0]):
        ref = _reference_numpy(ob_np[b:b + 1], hull_np[b], bodies_np[b],
                               joints_np[b], lidar_np[b],
                               grid_edge=grid_edge, grid_scale=grid_scale,
                               use_lidar=use_lidar,
                               project_to_grid=project_to_grid)
        np.testing.assert_allclose(np.asarray(out[b:b + 1]), ref,
                                   rtol=1e-6, atol=1e-6)


if __name__ == "__main__":
    observation_dim = 32
    grid_edge = 16
    grid_scale = 8.0
    use_lidar = True
    project_to_grid = False

    def make_inputs(key, B, Nb, Nj, Nl):
        k_ob, k_hull, k_b, k_j, k_l = jax.random.split(key, 5)
        ob = jax.random.normal(k_ob, (B, observation_dim), dtype=jnp.float32)
        hull_xy = jax.random.uniform(k_hull, (B, 2), minval=-1.0, maxval=1.0,
                                     dtype=jnp.float32)
        bodies = hull_xy[:, None, :] + jax.random.uniform(
            k_b, (B, Nb, 2), minval=-3.0, maxval=3.0, dtype=jnp.float32)
        joints = jnp.concatenate([hull_xy, hull_xy], axis=1)[:, None, :] + \
            jax.random.uniform(k_j, (B, Nj, 4), minval=-3.0, maxval=3.0,
                               dtype=jnp.float32)
        lidar_p2 = hull_xy[:, None, :] + jax.random.uniform(
            k_l, (B, Nl, 2), minval=-3.0, maxval=3.0, dtype=jnp.float32)
        return ob, hull_xy, bodies, joints, lidar_p2

    key = jax.random.PRNGKey(0)
    k1, k2 = jax.random.split(key)

    # --- Small batch (B=4): single grid step (TB = padded B = 8). ---
    B, Nb, Nj, Nl = 4, 3, 2, 4
    ob, hull_xy, bodies, joints, lidar_p2 = make_inputs(k1, B, Nb, Nj, Nl)
    out_b = flat_nngrid_forward_batched(
        ob, hull_xy, bodies, joints, lidar_p2,
        grid_edge=grid_edge, grid_scale=grid_scale,
        use_lidar=use_lidar, project_to_grid=project_to_grid)
    out_b = jax.block_until_ready(out_b)
    assert out_b.shape == (B, observation_dim + grid_edge * grid_edge), out_b.shape
    _check_batch(out_b, ob, hull_xy, bodies, joints, lidar_p2,
                 grid_edge=grid_edge, grid_scale=grid_scale,
                 use_lidar=use_lidar, project_to_grid=project_to_grid)

    # Single-env call matching the module's forward signature / shapes.
    out_s = flat_nngrid_forward(
        ob[0:1], hull_xy[0], bodies[0], joints[0], lidar_p2[0],
        grid_edge=grid_edge, grid_scale=grid_scale,
        use_lidar=use_lidar, project_to_grid=project_to_grid)
    out_s = jax.block_until_ready(out_s)
    assert out_s.shape == (1, observation_dim + grid_edge * grid_edge), out_s.shape
    np.testing.assert_allclose(np.asarray(out_s), np.asarray(out_b[0:1]),
                               rtol=0, atol=0)

    # --- Larger batch (B=100) with env_block=32: multi-step parallel grid
    #     (Bp=128, 4 steps) exercising the batch-padding path. ---
    B2 = 100
    ob2, hull2, bodies2, joints2, lidar2 = make_inputs(k2, B2, Nb, Nj, Nl)
    out2 = flat_nngrid_forward_batched(
        ob2, hull2, bodies2, joints2, lidar2,
        grid_edge=grid_edge, grid_scale=grid_scale,
        use_lidar=use_lidar, project_to_grid=project_to_grid, env_block=32)
    out2 = jax.block_until_ready(out2)
    assert out2.shape == (B2, observation_dim + grid_edge * grid_edge), out2.shape
    _check_batch(out2, ob2, hull2, bodies2, joints2, lidar2,
                 grid_edge=grid_edge, grid_scale=grid_scale,
                 use_lidar=use_lidar, project_to_grid=project_to_grid)

    print("KERNEL_OK")
</pallas_src>

<mosaic_0001>
module attributes {stable_mosaic.version = 11 : i64} {
  func.func @kernel(%arg0: i32, %arg1: memref<2x8x11xf32, #tpu.memory_space<vmem>>, %arg2: memref<8x256xf32, #tpu.memory_space<vmem>>) attributes {dimension_semantics = [#tpu.dimension_semantics<parallel>], iteration_bounds = array<i64: 1>, scalar_prefetch = 0 : i64, scratch_operands = 0 : i64, tpu.core_type = #tpu.core_type<tc>, window_params = [{transform_indices = @transform_0, window_bounds = array<i64: 2, 8, 11>}, {transform_indices = @transform_1, window_bounds = array<i64: 8, 256>}]} {
    %c0 = arith.constant 0 : index
    %c0_0 = arith.constant 0 : index
    %c0_1 = arith.constant 0 : index
    %0 = vector.load %arg1[%c0, %c0_0, %c0_1] : memref<2x8x11xf32, #tpu.memory_space<vmem>>, vector<1x8x11xf32>
    %1 = vector.shape_cast %0 : vector<1x8x11xf32> to vector<8x11xf32>
    %c1 = arith.constant 1 : index
    %c0_2 = arith.constant 0 : index
    %c0_3 = arith.constant 0 : index
    %2 = vector.load %arg1[%c1, %c0_2, %c0_3] : memref<2x8x11xf32, #tpu.memory_space<vmem>>, vector<1x8x11xf32>
    %3 = vector.shape_cast %2 : vector<1x8x11xf32> to vector<8x11xf32>
    %cst = arith.constant 2.000000e+00 : f32
    %4 = vector.broadcast %cst : f32 to vector<8x11xf32>
    %5 = arith.mulf %1, %4 : vector<8x11xf32>
    %cst_4 = arith.constant 2.000000e+00 : f32
    %6 = vector.broadcast %cst_4 : f32 to vector<8x11xf32>
    %7 = arith.mulf %3, %6 : vector<8x11xf32>
    %8 = math.floor %5 : vector<8x11xf32>
    %cst_5 = arith.constant 1.500000e+01 : f32
    %9 = vector.broadcast %cst_5 : f32 to vector<8x11xf32>
    %10 = arith.minimumf %8, %9 : vector<8x11xf32>
    %11 = math.floor %7 : vector<8x11xf32>
    %cst_6 = arith.constant 1.500000e+01 : f32
    %12 = vector.broadcast %cst_6 : f32 to vector<8x11xf32>
    %13 = arith.minimumf %11, %12 : vector<8x11xf32>
    %14 = arith.fptosi %10 : vector<8x11xf32> to vector<8x11xi32>
    %15 = arith.fptosi %13 : vector<8x11xf32> to vector<8x11xi32>
    %c0_i32 = arith.constant 0 : i32
    %16 = vector.broadcast %c0_i32 : i32 to vector<8x11xi32>
    %17 = arith.cmpi slt, %14, %16 : vector<8x11xi32>
    %c16_i32 = arith.constant 16 : i32
    %18 = vector.broadcast %c16_i32 : i32 to vector<8x11xi32>
    %19 = arith.addi %14, %18 : vector<8x11xi32>
    %20 = arith.select %17, %19, %14 : vector<8x11xi1>, vector<8x11xi32>
    %c0_i32_7 = arith.constant 0 : i32
    %21 = vector.broadcast %c0_i32_7 : i32 to vector<8x11xi32>
    %22 = arith.cmpi slt, %15, %21 : vector<8x11xi32>
    %c16_i32_8 = arith.constant 16 : i32
    %23 = vector.broadcast %c16_i32_8 : i32 to vector<8x11xi32>
    %24 = arith.addi %15, %23 : vector<8x11xi32>
    %25 = arith.select %22, %24, %15 : vector<8x11xi1>, vector<8x11xi32>
    %c0_i32_9 = arith.constant 0 : i32
    %26 = vector.broadcast %c0_i32_9 : i32 to vector<8x11xi32>
    %27 = arith.cmpi sge, %20, %26 : vector<8x11xi32>
    %c16_i32_10 = arith.constant 16 : i32
    %28 = vector.broadcast %c16_i32_10 : i32 to vector<8x11xi32>
    %29 = arith.cmpi slt, %20, %28 : vector<8x11xi32>
    %30 = arith.andi %27, %29 : vector<8x11xi1>
    %c0_i32_11 = arith.constant 0 : i32
    %31 = vector.broadcast %c0_i32_11 : i32 to vector<8x11xi32>
    %32 = arith.cmpi sge, %25, %31 : vector<8x11xi32>
    %33 = arith.andi %30, %32 : vector<8x11xi1>
    %c16_i32_12 = arith.constant 16 : i32
    %34 = vector.broadcast %c16_i32_12 : i32 to vector<8x11xi32>
    %35 = arith.cmpi slt, %25, %34 : vector<8x11xi32>
    %36 = arith.andi %33, %35 : vector<8x11xi1>
    %c16_i32_13 = arith.constant 16 : i32
    %37 = vector.broadcast %c16_i32_13 : i32 to vector<8x11xi32>
    %38 = arith.muli %20, %37 : vector<8x11xi32>
    %39 = arith.addi %38, %25 : vector<8x11xi32>
    %c-1_i32 = arith.constant -1 : i32
    %40 = vector.broadcast %c-1_i32 : i32 to vector<8x11xi32>
    %41 = arith.select %36, %39, %40 : vector<8x11xi1>, vector<8x11xi32>
    %42 = tpu.iota {dimensions = array<i32: 1>} : vector<1x256xi32>
    %43 = vector.extract_strided_slice %41 {offsets = [0, 0], sizes = [8, 1], strides = [1, 1]} : vector<8x11xi32> to vector<8x1xi32>
    %44 = vector.broadcast %43 : vector<8x1xi32> to vector<8x256xi32>
    %45 = vector.broadcast %42 : vector<1x256xi32> to vector<8x256xi32>
    %46 = arith.cmpi eq, %44, %45 : vector<8x256xi32>
    %47 = vector.extract_strided_slice %41 {offsets = [0, 1], sizes = [8, 1], strides = [1, 1]} : vector<8x11xi32> to vector<8x1xi32>
    %48 = vector.broadcast %47 : vector<8x1xi32> to vector<8x256xi32>
    %49 = vector.broadcast %42 : vector<1x256xi32> to vector<8x256xi32>
    %50 = arith.cmpi eq, %48, %49 : vector<8x256xi32>
    %51 = arith.ori %46, %50 : vector<8x256xi1>
    %52 = vector.extract_strided_slice %41 {offsets = [0, 2], sizes = [8, 1], strides = [1, 1]} : vector<8x11xi32> to vector<8x1xi32>
    %53 = vector.broadcast %52 : vector<8x1xi32> to vector<8x256xi32>
    %54 = vector.broadcast %42 : vector<1x256xi32> to vector<8x256xi32>
    %55 = arith.cmpi eq, %53, %54 : vector<8x256xi32>
    %56 = arith.ori %51, %55 : vector<8x256xi1>
    %57 = vector.extract_strided_slice %41 {offsets = [0, 3], sizes = [8, 1], strides = [1, 1]} : vector<8x11xi32> to vector<8x1xi32>
    %58 = vector.broadcast %57 : vector<8x1xi32> to vector<8x256xi32>
    %59 = vector.broadcast %42 : vector<1x256xi32> to vector<8x256xi32>
    %60 = arith.cmpi eq, %58, %59 : vector<8x256xi32>
    %61 = arith.ori %56, %60 : vector<8x256xi1>
    %62 = vector.extract_strided_slice %41 {offsets = [0, 4], sizes = [8, 1], strides = [1, 1]} : vector<8x11xi32> to vector<8x1xi32>
    %63 = vector.broadcast %62 : vector<8x1xi32> to vector<8x256xi32>
    %64 = vector.broadcast %42 : vector<1x256xi32> to vector<8x256xi32>
    %65 = arith.cmpi eq, %63, %64 : vector<8x256xi32>
    %66 = arith.ori %61, %65 : vector<8x256xi1>
    %67 = vector.extract_strided_slice %41 {offsets = [0, 5], sizes = [8, 1], strides = [1, 1]} : vector<8x11xi32> to vector<8x1xi32>
    %68 = vector.broadcast %67 : vector<8x1xi32> to vector<8x256xi32>
    %69 = vector.broadcast %42 : vector<1x256xi32> to vector<8x256xi32>
    %70 = arith.cmpi eq, %68, %69 : vector<8x256xi32>
    %71 = arith.ori %66, %70 : vector<8x256xi1>
    %72 = vector.extract_strided_slice %41 {offsets = [0, 6], sizes = [8, 1], strides = [1, 1]} : vector<8x11xi32> to vector<8x1xi32>
    %73 = vector.broadcast %72 : vector<8x1xi32> to vector<8x256xi32>
    %74 = vector.broadcast %42 : vector<1x256xi32> to vector<8x256xi32>
    %75 = arith.cmpi eq, %73, %74 : vector<8x256xi32>
    %76 = arith.ori %71, %75 : vector<8x256xi1>
    %77 = vector.extract_strided_slice %41 {offsets = [0, 7], sizes = [8, 1], strides = [1, 1]} : vector<8x11xi32> to vector<8x1xi32>
    %78 = vector.broadcast %77 : vector<8x1xi32> to vector<8x256xi32>
    %79 = vector.broadcast %42 : vector<1x256xi32> to vector<8x256xi32>
    %80 = arith.cmpi eq, %78, %79 : vector<8x256xi32>
    %81 = arith.ori %76, %80 : vector<8x256xi1>
    %82 = vector.extract_strided_slice %41 {offsets = [0, 8], sizes = [8, 1], strides = [1, 1]} : vector<8x11xi32> to vector<8x1xi32>
    %83 = vector.broadcast %82 : vector<8x1xi32> to vector<8x256xi32>
    %84 = vector.broadcast %42 : vector<1x256xi32> to vector<8x256xi32>
    %85 = arith.cmpi eq, %83, %84 : vector<8x256xi32>
    %86 = arith.ori %81, %85 : vector<8x256xi1>
    %87 = vector.extract_strided_slice %41 {offsets = [0, 9], sizes = [8, 1], strides = [1, 1]} : vector<8x11xi32> to vector<8x1xi32>
    %88 = vector.broadcast %87 : vector<8x1xi32> to vector<8x256xi32>
    %89 = vector.broadcast %42 : vector<1x256xi32> to vector<8x256xi32>
    %90 = arith.cmpi eq, %88, %89 : vector<8x256xi32>
    %91 = arith.ori %86, %90 : vector<8x256xi1>
    %92 = vector.extract_strided_slice %41 {offsets = [0, 10], sizes = [8, 1], strides = [1, 1]} : vector<8x11xi32> to vector<8x1xi32>
    %93 = vector.broadcast %92 : vector<8x1xi32> to vector<8x256xi32>
    %94 = vector.broadcast %42 : vector<1x256xi32> to vector<8x256xi32>
    %95 = arith.cmpi eq, %93, %94 : vector<8x256xi32>
    %96 = arith.ori %91, %95 : vector<8x256xi1>
    %97 = arith.extui %96 : vector<8x256xi1> to vector<8x256xi32>
    %98 = arith.sitofp %97 : vector<8x256xi32> to vector<8x256xf32>
    %c0_14 = arith.constant 0 : index
    %c0_15 = arith.constant 0 : index
    %99 = vector.load %arg2[%c0_14, %c0_15] : memref<8x256xf32, #tpu.memory_space<vmem>>, vector<8x256xf32>
    tpu.vector_store %arg2[%c0_14, %c0_15], %98 {strides = array<i32>} : memref<8x256xf32, #tpu.memory_space<vmem>>, vector<8x256xf32>,
    return
  }
  func.func @transform_0(%arg0: i32) -> (i32, i32, i32) {
    %c0_i32 = arith.constant 0 : i32
    %c0_i32_0 = arith.constant 0 : i32
    %c0_i32_1 = arith.constant 0 : i32
    return %c0_i32, %arg0, %c0_i32_0 : i32, i32, i32
  }
  func.func @transform_1(%arg0: i32) -> (i32, i32) {
    %c0_i32 = arith.constant 0 : i32
    %c0_i32_0 = arith.constant 0 : i32
    return %arg0, %c0_i32 : i32, i32
  }
}

</mosaic_0001>

<bundles_post_ra>
// kernel: flat_nngrid_forward_batched.1
= control target key start
LH: loop header
LB: loop body
LE: loop exit
PB: predicated region body
PF: predicated region fallthrough
CT: control target
= control target key end

     0   :  { %v154_v0 = vmov 2   ;;  %v155_v1 = vmov 0   ;;  %v156_v21 = vmov 3   ;;  %v157_v22 = vmov 1   ;;  %s188_s0 = inlined_call_operand.vmem [shape: f32[2,8,11], index: 0, kind: input, shape index: {}]   ;;  %s189_s1 = inlined_call_operand.vmem [shape: f32[8,256], index: 1, kind: output, shape index: {}]  }
   0x1   :  { %144 = vset.pattern.permute.xlu1 %v154_v0  ;;  %142 = vset.pattern.permute.xlu0 %v155_v1  ;;  %v8_v2 = vld [vmem:[%s188_s0] sm:$0xff]  ;;  %v123_v3 = vld [vmem:[%s188_s0 + $0x8] sm:$0xff]  ;;  %v158_v23 = vmov 4   ;;  %v159_v24 = vmov 5   ;;  %v160_v25 = vmov 6   ;;  %v161_v26 = vmov 8  }
   0x2   :  { %v11_v4 = vmul.f32 2.0, %v8_v2  ;;  %v12_v5 = vmul.f32 2.0, %v123_v3  ;;  %v162_v27 = vmov 7   ;;  %v163_v28 = vmov 10  }
   0x3   :  { %v164_v29 = vmov 9   ;;  %v35_v30 = vlaneseq  ;;  %v165_v44 = vmov 0.0  }
   0x4   :  { %v13_v6 = vfloor.f32 %v11_v4  ;;  %v15_v7 = vfloor.f32 %v12_v5 }
   0x5   :  { %v36_v33 = vand.u32 127, %v35_v30 }
   0x6   :  { %v14_v8 = vmin.f32 %v13_v6, 15.0  ;;  %v16_v9 = vmin.f32 %v15_v7, 15.0 }
   0x7   :  { %v37_v36 = vadd.s32 128, %v36_v33 }
   0x8   :  { %v126_v10 = vtrunc.f32 %v14_v8  ;;  %v128_v11 = vtrunc.f32 %v16_v9 }
   0xa   :  { %v127_v12 = vcvt.f32.s32 %v126_v10  ;;  %v129_v13 = vcvt.f32.s32 %v128_v11 }
   0xc   :  { %vm19_vm0 = vcmp.lt.s32.totalorder %v127_v12, 0  ;;  %v20_v14 = vadd.s32 16, %v127_v12  ;;  %vm22_vm1 = vcmp.lt.s32.totalorder %v129_v13, 0  ;;  %v23_v15 = vadd.s32 16, %v129_v13 }
   0xe   :  { %v21_v16 = vsel %vm19_vm0, %v20_v14, %v127_v12  ;;  %v24_v17 = vsel %vm22_vm1, %v23_v15, %v129_v13 }
   0xf   :  { %vm25_vm2 = vcmp.ge.s32.totalorder %v21_v16, 0  ;;  %vm26_vm3 = vcmp.lt.s32.totalorder %v21_v16, 16  ;;  %vm28_vm4 = vcmp.ge.s32.totalorder %v24_v17, 0  ;;  %vm30_vm5 = vcmp.lt.s32.totalorder %v24_v17, 16 }
  0x10   :  { %vm27_vm6 = vmand %vm25_vm2, %vm26_vm3  ;;  %v32_v18 = vmul.u32 16, %v21_v16 }
  0x11   :  { %vm29_vm7 = vmand %vm27_vm6, %vm28_vm4 }
  0x12   :  { %vm31_vm8 = vmand %vm29_vm7, %vm30_vm5  ;;  %v33_v19 = vadd.s32 %v32_v18, %v24_v17 }
  0x14   :  { %v34_v20 = vsel %vm31_vm8, %v33_v19, 4294967295 }
  0x15   :  { %51 = vperm.xlu1 %144, %v34_v20   ;;  %39 = vperm.xlu0 %142, %v34_v20  }
  0x19   :  { %145 = vset.pattern.permute.xlu1 %v156_v21  ;;  %143 = vset.pattern.permute.xlu0 %v157_v22 }
  0x1a   :  { %58 = vperm.xlu1 %145, %v34_v20   ;;  %44 = vperm.xlu0 %143, %v34_v20  }
  0x1e   :  { %146 = vset.pattern.permute.xlu1 %v158_v23  ;;  %147 = vset.pattern.permute.xlu0 %v159_v24 }
  0x1f   :  { %65 = vperm.xlu1 %146, %v34_v20   ;;  %72 = vperm.xlu0 %147, %v34_v20  }
  0x23   :  { %148 = vset.pattern.permute.xlu1 %v160_v25  ;;  %150 = vset.pattern.permute.xlu0 %v161_v26 }
  0x24   :  { %79 = vperm.xlu1 %148, %v34_v20   ;;  %93 = vperm.xlu0 %150, %v34_v20  }
  0x28   :  { %149 = vset.pattern.permute.xlu1 %v162_v27  ;;  %153 = vset.pattern.permute.xlu0 %v163_v28 }
  0x29   :  { %86 = vperm.xlu1 %149, %v34_v20  }
  0x2d   :  { %151 = vset.pattern.permute.xlu1 %v164_v29 }
  0x2e   :  { %100 = vperm.xlu1 %151, %v34_v20  }
  0x32   :  { %152 = vset.pattern.permute.xlu1 %v163_v28 }
  0x33   :  { %107 = vperm.xlu1 %152, %v34_v20  }
  0x94   :  { %v52_v31 = vpop.permute.xlu1 %51  ;;  %v40_v32 = vpop.permute.xlu0 %39 }
  0x95   :  { %vm41_vm9 = vcmp.eq.s32.totalorder %v40_v32, %v36_v33  ;;  %vm42_vm11 = vcmp.eq.s32.totalorder %v40_v32, %v37_v36  ;;  %vm53_vm15 = vcmp.eq.s32.totalorder %v52_v31, %v36_v33  ;;  %vm54_vm0 = vcmp.eq.s32.totalorder %v52_v31, %v37_v36 }
  0x99   :  { %v59_v34 = vpop.permute.xlu1 %58  ;;  %v45_v35 = vpop.permute.xlu0 %44 }
  0x9a   :  { %vm46_vm10 = vcmp.eq.s32.totalorder %v45_v35, %v36_v33  ;;  %vm47_vm12 = vcmp.eq.s32.totalorder %v45_v35, %v37_v36  ;;  %vm60_vm3 = vcmp.eq.s32.totalorder %v59_v34, %v36_v33  ;;  %vm61_vm5 = vcmp.eq.s32.totalorder %v59_v34, %v37_v36 }
  0x9b   :  { %vm48_vm13 = vmor %vm41_vm9, %vm46_vm10 }
  0x9c   :  { %vm49_vm14 = vmor %vm42_vm11, %vm47_vm12 }
  0x9d   :  { %vm55_vm1 = vmor %vm48_vm13, %vm53_vm15 }
  0x9e   :  { %v66_v37 = vpop.permute.xlu1 %65  ;;  %vm56_vm2 = vmor %vm49_vm14, %vm54_vm0  ;;  %v73_v38 = vpop.permute.xlu0 %72 }
  0x9f   :  { %vm67_vm4 = vcmp.eq.s32.totalorder %v66_v37, %v36_v33  ;;  %vm62_vm6 = vmor %vm55_vm1, %vm60_vm3  ;;  %vm68_vm7 = vcmp.eq.s32.totalorder %v66_v37, %v37_v36  ;;  %vm74_vm10 = vcmp.eq.s32.totalorder %v73_v38, %v36_v33  ;;  %vm75_vm12 = vcmp.eq.s32.totalorder %v73_v38, %v37_v36 }
  0xa0   :  { %vm63_vm8 = vmor %vm56_vm2, %vm61_vm5 }
  0xa1   :  { %vm69_vm9 = vmor %vm62_vm6, %vm67_vm4 }
  0xa2   :  { %vm70_vm11 = vmor %vm63_vm8, %vm68_vm7 }
  0xa3   :  { %v80_v39 = vpop.permute.xlu1 %79  ;;  %vm76_vm15 = vmor %vm69_vm9, %vm74_vm10  ;;  %v94_v41 = vpop.permute.xlu0 %93 }
  0xa4   :  { %vm81_vm13 = vcmp.eq.s32.totalorder %v80_v39, %v36_v33  ;;  %vm82_vm0 = vcmp.eq.s32.totalorder %v80_v39, %v37_v36  ;;  %vm77_vm14 = vmor %vm70_vm11, %vm75_vm12  ;;  %vm95_vm6 = vcmp.eq.s32.totalorder %v94_v41, %v36_v33  ;;  %vm96_vm8 = vcmp.eq.s32.totalorder %v94_v41, %v37_v36 }
  0xa5   :  { %vm83_vm3 = vmor %vm76_vm15, %vm81_vm13 }
  0xa6   :  { %vm84_vm5 = vmor %vm77_vm14, %vm82_vm0 }
  0xa8   :  { %v87_v40 = vpop.permute.xlu1 %86 }
  0xa9   :  { %vm88_vm1 = vcmp.eq.s32.totalorder %v87_v40, %v36_v33  ;;  %vm89_vm2 = vcmp.eq.s32.totalorder %v87_v40, %v37_v36 }
  0xaa   :  { %vm90_vm4 = vmor %vm83_vm3, %vm88_vm1 }
  0xab   :  { %vm91_vm7 = vmor %vm84_vm5, %vm89_vm2 }
  0xac   :  { %vm97_vm10 = vmor %vm90_vm4, %vm95_vm6 }
  0xad   :  { %v101_v42 = vpop.permute.xlu1 %100  ;;  %vm98_vm12 = vmor %vm91_vm7, %vm96_vm8 }
  0xae   :  { %vm102_vm9 = vcmp.eq.s32.totalorder %v101_v42, %v36_v33  ;;  %vm103_vm11 = vcmp.eq.s32.totalorder %v101_v42, %v37_v36 }
  0xaf   :  { %vm104_vm13 = vmor %vm97_vm10, %vm102_vm9 }
  0xb0   :  { %vm105_vm15 = vmor %vm98_vm12, %vm103_vm11 }
  0xb2   :  { %v108_v43 = vpop.permute.xlu1 %107 }
  0xb3   :  { %vm109_vm0 = vcmp.eq.s32.totalorder %v108_v43, %v36_v33  ;;  %vm110_vm14 = vcmp.eq.s32.totalorder %v108_v43, %v37_v36 }
  0xb4   :  { %vm111_vm1 = vmor %vm104_vm13, %vm109_vm0 }
  0xb5   :  { %vm112_vm3 = vmor %vm105_vm15, %vm110_vm14  ;;  %v124_v45 = vsel %vm111_vm1, 1.0, %v165_v44 }
  0xb6   :  { %v125_v46 = vsel %vm112_vm3, 1.0, %v165_v44  ;;  %117 = vst [vmem:[%s189_s1] sm:$0xff] %v124_v45 }
  0xb7   :  { %118 = vst [vmem:[%s189_s1 + $0x8] sm:$0xff] %v125_v46 }

</bundles_post_ra>
